<compile_context>
chip_gen: v6e
topology: v6e:2x2x1
jax: 0.10.0
libtpu: 0.0.40
codegen_flags: <defaults>
</compile_context>

<pallas_src>
import functools

import jax
import jax.numpy as jnp
from jax import lax
from jax.experimental import pallas as pl
from jax.experimental.pallas import tpu as pltpu

# ----- module hyper-parameters (from the PyTorch script) -----
DUR_EMBEDDING_SIZE = 10
DUR_INPUT_SIZE = 20
HIDDEN_SIZE = 256
PITCH_EMBEDDING_SIZE = 10
PITCH_INPUT_SIZE = 63
INPUT_SIZE = PITCH_EMBEDDING_SIZE + DUR_EMBEDDING_SIZE  # 20


def _note_lstm_fused_kernel(T,                 # static: number of notes (loop trip count)
                            notes_ref,         # (T, 2) int32, SMEM (scalar prefetch)
                            pitch_ref,         # (63, 4H) f32  VMEM (bias folded in)
                            dur_ref,           # (20, 4H) f32  VMEM
                            whh_ref,           # (H, 4H)  bf16 VMEM
                            h0_ref, c0_ref,    # (1, H)   f32  initial states
                            out_ref,           # (T_pad, H) f32 VMEM-resident output block
                            h_out_ref, c_out_ref):  # (1, H) f32 final states
    H = HIDDEN_SIZE
    whh = whh_ref[...]                         # (H, 4H) bf16, loaded once for all steps

    def step(t, carry):
        h, c = carry                           # (1, H) f32 each

        # Gather the two precomputed input-projection rows (bias already folded in).
        p_idx = notes_ref[t, 0]
        d_idx = notes_ref[t, 1]
        x_proj = pitch_ref[pl.ds(p_idx, 1), :] + dur_ref[pl.ds(d_idx, 1), :]   # (1, 4H) f32

        # Gate pre-activations: one (1,H)x(H,4H) bf16 GEMV on the MXU, f32 accumulate.
        gates = x_proj + jnp.dot(h.astype(jnp.bfloat16), whh,
                                 preferred_element_type=jnp.float32)           # (1, 4H)

        # Gate order (after init-time permutation): [i, f, o, g].
        sig = jax.nn.sigmoid(gates[:, :3 * H])   # one contiguous sigmoid over (1, 3H)
        i_g = sig[:, 0:H]
        f_g = sig[:, H:2 * H]
        o_g = sig[:, 2 * H:3 * H]
        g_g = jnp.tanh(gates[:, 3 * H:4 * H])

        c_new = f_g * c + i_g * g_g
        h_new = o_g * jnp.tanh(c_new)

        out_ref[pl.ds(t, 1), :] = h_new          # VMEM store; single HBM writeback at end
        return h_new, c_new

    h_fin, c_fin = lax.fori_loop(0, T, step, (h0_ref[...], c0_ref[...]),
                                 unroll=True)
    h_out_ref[...] = h_fin
    c_out_ref[...] = c_fin


def note_encoder_lstm_pallas(params, notes, h0, c0):
    """Run the LSTM over a sequence of notes inside one fused pallas_call.

    notes: (T, 2) int32, column 0 = pitch index, column 1 = duration index.
    h0, c0: (1, HIDDEN_SIZE) float32.
    Returns (out_seq (T, H), h_final (1, H), c_final (1, H)).
    """
    T = int(notes.shape[0])
    H = HIDDEN_SIZE
    T_pad = max(8, ((T + 7) // 8) * 8)           # sublane-aligned output slab

    grid_spec = pltpu.PrefetchScalarGridSpec(
        num_scalar_prefetch=1,                   # notes -> SMEM, visible to the kernel
        grid=(1,),                               # single kernel invocation; loop is inside
        in_specs=[
            pl.BlockSpec((PITCH_INPUT_SIZE, 4 * H), lambda i, n: (0, 0)),  # pitch_proj (+bias)
            pl.BlockSpec((DUR_INPUT_SIZE, 4 * H), lambda i, n: (0, 0)),    # dur_proj
            pl.BlockSpec((H, 4 * H), lambda i, n: (0, 0)),                 # W_hh (bf16)
            pl.BlockSpec((1, H), lambda i, n: (0, 0)),                     # h0
            pl.BlockSpec((1, H), lambda i, n: (0, 0)),                     # c0
        ],
        out_specs=(
            pl.BlockSpec((T_pad, H), lambda i, n: (0, 0)),                 # out_seq (padded)
            pl.BlockSpec((1, H), lambda i, n: (0, 0)),                     # h_final
            pl.BlockSpec((1, H), lambda i, n: (0, 0)),                     # c_final
        ),
    )

    out_pad, h_n, c_n = pl.pallas_call(
        functools.partial(_note_lstm_fused_kernel, T),
        out_shape=(jax.ShapeDtypeStruct((T_pad, H), jnp.float32),
                   jax.ShapeDtypeStruct((1, H), jnp.float32),
                   jax.ShapeDtypeStruct((1, H), jnp.float32)),
        grid_spec=grid_spec,
        compiler_params=pltpu.CompilerParams(
            dimension_semantics=("arbitrary",)),
    )(notes.astype(jnp.int32), params.pitch_proj, params.dur_proj,
      params.w_hh_t_k, h0, c0)

    return out_pad[:T], h_n, c_n


class NoteEncoderParams:
    """Parameters in PyTorch layout (for the reference) + precomputed kernel layout."""

    def __init__(self, key):
        H = HIDDEN_SIZE
        k_pe, k_de, k_wih, k_whh, k_bih, k_bhh = jax.random.split(key, 6)

        # --- PyTorch-convention master parameters (f32, gate order [i, f, g, o]) ---
        self.pitch_embedding = jax.random.normal(
            k_pe, (PITCH_INPUT_SIZE, PITCH_EMBEDDING_SIZE), jnp.float32)
        self.dur_embedding = jax.random.normal(
            k_de, (DUR_INPUT_SIZE, DUR_EMBEDDING_SIZE), jnp.float32)
        bound = 1.0 / (H ** 0.5)
        self.w_ih = jax.random.uniform(
            k_wih, (4 * H, INPUT_SIZE), jnp.float32, -bound, bound)
        self.w_hh = jax.random.uniform(
            k_whh, (4 * H, H), jnp.float32, -bound, bound)
        self.b_ih = jax.random.uniform(k_bih, (4 * H,), jnp.float32, -bound, bound)
        self.b_hh = jax.random.uniform(k_bhh, (4 * H,), jnp.float32, -bound, bound)

        # --- kernel-side derived parameters ---
        # Re-pack gate columns [i, f, g, o] -> [i, f, o, g] (contiguous sigmoid block).
        perm = jnp.concatenate([jnp.arange(0, H), jnp.arange(H, 2 * H),
                                jnp.arange(3 * H, 4 * H), jnp.arange(2 * H, 3 * H)])
        w_ih_t = self.w_ih.T[:, perm]            # (20, 4H)
        w_hh_t = self.w_hh.T[:, perm]            # (H, 4H)
        bias = (self.b_ih + self.b_hh)[perm]     # (4H,)

        # Fold embedding lookup + x @ W_ih into two projection tables; fold the
        # combined bias into the pitch table so the kernel never adds it.
        self.pitch_proj = (jnp.dot(self.pitch_embedding,
                                   w_ih_t[:PITCH_EMBEDDING_SIZE])
                           + bias.reshape(1, 4 * H))                       # (63, 4H) f32
        self.dur_proj = jnp.dot(self.dur_embedding,
                                w_ih_t[PITCH_EMBEDDING_SIZE:])             # (20, 4H) f32
        self.w_hh_t_k = w_hh_t.astype(jnp.bfloat16)                        # (H, 4H) bf16


def note_encoder_forward(params, note, hn, cn):
    """Mirrors Note_encoder.forward (single note).

    note: int32 array of shape (2,) -> note[0] = pitch index, note[1] = dur index
    hn, cn: (1, 1, HIDDEN_SIZE) float32
    returns: (output, (hn, cn)) with output/hn/cn of shape (1, 1, HIDDEN_SIZE)
    """
    notes = note.reshape(1, 2).astype(jnp.int32)
    h0 = hn.reshape(1, HIDDEN_SIZE)
    c0 = cn.reshape(1, HIDDEN_SIZE)
    out_seq, h_n, c_n = note_encoder_lstm_pallas(params, notes, h0, c0)
    output = out_seq.reshape(1, 1, HIDDEN_SIZE)
    return output, (h_n.reshape(1, 1, HIDDEN_SIZE), c_n.reshape(1, 1, HIDDEN_SIZE))


def note_encoder_reference(params, notes, hn, cn):
    """Pure-JAX f32 reference with torch.nn.LSTM semantics (gate order [i, f, g, o])."""
    H = HIDDEN_SIZE
    h = hn.reshape(1, H)
    c = cn.reshape(1, H)
    outs = []
    for t in range(notes.shape[0]):
        x = jnp.concatenate([params.pitch_embedding[notes[t, 0]],
                             params.dur_embedding[notes[t, 1]]]).reshape(1, INPUT_SIZE)
        gates = x @ params.w_ih.T + h @ params.w_hh.T + params.b_ih + params.b_hh
        i_g = jax.nn.sigmoid(gates[:, 0:H])
        f_g = jax.nn.sigmoid(gates[:, H:2 * H])
        g_g = jnp.tanh(gates[:, 2 * H:3 * H])
        o_g = jax.nn.sigmoid(gates[:, 3 * H:4 * H])
        c = f_g * c + i_g * g_g
        h = o_g * jnp.tanh(c)
        outs.append(h)
    return jnp.concatenate(outs, axis=0), h, c


if __name__ == "__main__":
    key = jax.random.PRNGKey(0)
    k_params, k_h, k_c, k_p, k_d = jax.random.split(key, 5)

    params = NoteEncoderParams(k_params)

    # initHidden -> zeros; use small random states to also exercise the recurrence.
    hn = 0.1 * jax.random.normal(k_h, (1, 1, HIDDEN_SIZE), jnp.float32)
    cn = 0.1 * jax.random.normal(k_c, (1, 1, HIDDEN_SIZE), jnp.float32)

    # --- single-note forward (exact Note_encoder.forward semantics, T = 1) ---
    note = jnp.array([5, 3], dtype=jnp.int32)
    output, (hn1, cn1) = note_encoder_forward(params, note, hn, cn)
    jax.block_until_ready((output, hn1, cn1))
    assert output.shape == (1, 1, HIDDEN_SIZE)
    assert hn1.shape == (1, 1, HIDDEN_SIZE)
    assert cn1.shape == (1, 1, HIDDEN_SIZE)

    # --- multi-note sequence: fused time loop, weights/tables loaded once ---
    T = 8
    pitches = jax.random.randint(k_p, (T, 1), 0, PITCH_INPUT_SIZE, dtype=jnp.int32)
    durs = jax.random.randint(k_d, (T, 1), 0, DUR_INPUT_SIZE, dtype=jnp.int32)
    notes = jnp.concatenate([pitches, durs], axis=1)

    out_seq, h_n, c_n = note_encoder_lstm_pallas(
        params, notes, hn.reshape(1, HIDDEN_SIZE), cn.reshape(1, HIDDEN_SIZE))
    jax.block_until_ready((out_seq, h_n, c_n))
    assert out_seq.shape == (T, HIDDEN_SIZE)

    # --- validate against the f32 PyTorch-semantics reference (bf16 W_hh => relaxed tol) ---
    ref_out, ref_h, ref_c = note_encoder_reference(params, notes, hn, cn)
    assert jnp.allclose(out_seq, ref_out, atol=2e-2, rtol=2e-2), \
        float(jnp.max(jnp.abs(out_seq - ref_out)))
    assert jnp.allclose(h_n, ref_h, atol=2e-2, rtol=2e-2)
    assert jnp.allclose(c_n, ref_c, atol=2e-2, rtol=2e-2)

    ref1_out, ref1_h, ref1_c = note_encoder_reference(params, note.reshape(1, 2), hn, cn)
    assert jnp.allclose(output.reshape(1, HIDDEN_SIZE), ref1_out, atol=2e-2, rtol=2e-2)

    print("KERNEL_OK")
</pallas_src>

<mosaic_0001>
module attributes {stable_mosaic.version = 11 : i64} {
  func.func @_note_lstm_fused_kernel(%arg0: i32, %arg1: memref<1x2xi32, #tpu.memory_space<smem>>, %arg2: memref<63x1024xf32, #tpu.memory_space<vmem>>, %arg3: memref<20x1024xf32, #tpu.memory_space<vmem>>, %arg4: memref<256x1024xbf16, #tpu.memory_space<vmem>>, %arg5: memref<1x256xf32, #tpu.memory_space<vmem>>, %arg6: memref<1x256xf32, #tpu.memory_space<vmem>>, %arg7: memref<8x256xf32, #tpu.memory_space<vmem>>, %arg8: memref<1x256xf32, #tpu.memory_space<vmem>>, %arg9: memref<1x256xf32, #tpu.memory_space<vmem>>) attributes {dimension_semantics = [#tpu.dimension_semantics<arbitrary>], iteration_bounds = array<i64: 1>, scalar_prefetch = 1 : i64, scratch_operands = 0 : i64, tpu.core_type = #tpu.core_type<tc>, window_params = [{pipeline_mode = #tpu.pipeline_mode<synchronous>, transform_indices = @transform_0, window_bounds = array<i64: 63, 1024>}, {pipeline_mode = #tpu.pipeline_mode<synchronous>, transform_indices = @transform_1, window_bounds = array<i64: 20, 1024>}, {pipeline_mode = #tpu.pipeline_mode<synchronous>, transform_indices = @transform_2, window_bounds = array<i64: 256, 1024>}, {pipeline_mode = #tpu.pipeline_mode<synchronous>, transform_indices = @transform_3, window_bounds = array<i64: 1, 256>}, {pipeline_mode = #tpu.pipeline_mode<synchronous>, transform_indices = @transform_4, window_bounds = array<i64: 1, 256>}, {pipeline_mode = #tpu.pipeline_mode<synchronous>, transform_indices = @transform_5, window_bounds = array<i64: 8, 256>}, {pipeline_mode = #tpu.pipeline_mode<synchronous>, transform_indices = @transform_6, window_bounds = array<i64: 1, 256>}, {pipeline_mode = #tpu.pipeline_mode<synchronous>, transform_indices = @transform_7, window_bounds = array<i64: 1, 256>}]} {
    %c0 = arith.constant 0 : index
    %c0_0 = arith.constant 0 : index
    %0 = vector.load %arg4[%c0, %c0_0] : memref<256x1024xbf16, #tpu.memory_space<vmem>>, vector<256x1024xbf16>
    %c0_1 = arith.constant 0 : index
    %c0_2 = arith.constant 0 : index
    %1 = vector.load %arg5[%c0_1, %c0_2] : memref<1x256xf32, #tpu.memory_space<vmem>>, vector<1x256xf32>
    %c0_3 = arith.constant 0 : index
    %c0_4 = arith.constant 0 : index
    %2 = vector.load %arg6[%c0_3, %c0_4] : memref<1x256xf32, #tpu.memory_space<vmem>>, vector<1x256xf32>
    %c0_i32 = arith.constant 0 : i32
    %3 = arith.index_cast %c0_i32 : i32 to index
    %c0_5 = arith.constant 0 : index
    %4 = memref.load %arg1[%3, %c0_5] : memref<1x2xi32, #tpu.memory_space<smem>>
    %5 = arith.index_cast %c0_i32 : i32 to index
    %c1 = arith.constant 1 : index
    %6 = memref.load %arg1[%5, %c1] : memref<1x2xi32, #tpu.memory_space<smem>>
    %7 = arith.index_cast %4 : i32 to index
    %c0_6 = arith.constant 0 : index
    %8 = vector.load %arg2[%7, %c0_6] : memref<63x1024xf32, #tpu.memory_space<vmem>>, vector<1x1024xf32>
    %9 = arith.index_cast %6 : i32 to index
    %c0_7 = arith.constant 0 : index
    %10 = vector.load %arg3[%9, %c0_7] : memref<20x1024xf32, #tpu.memory_space<vmem>>, vector<1x1024xf32>
    %11 = arith.addf %8, %10 : vector<1x1024xf32>
    %12 = arith.truncf %1 : vector<1x256xf32> to vector<1x256xbf16>
    %cst = arith.constant dense<0.000000e+00> : vector<1x1024xf32>
    %13 = tpu.matmul %12, %0, %cst {dimension_numbers = #tpu.dot_dimension_numbers<[1], [0], [0], [1], [0, 0, 1, 1], [], []>} : vector<1x256xbf16>, vector<256x1024xbf16>, vector<1x1024xf32> -> vector<1x1024xf32>
    %14 = arith.addf %11, %13 : vector<1x1024xf32>
    %15 = vector.extract_strided_slice %14 {offsets = [0, 0], sizes = [1, 768], strides = [1, 1]} : vector<1x1024xf32> to vector<1x768xf32>
    %16 = arith.negf %15 : vector<1x768xf32>
    %17 = math.exp %16 : vector<1x768xf32>
    %cst_8 = arith.constant 1.000000e+00 : f32
    %18 = vector.broadcast %cst_8 : f32 to vector<1x768xf32>
    %19 = arith.addf %18, %17 : vector<1x768xf32>
    %20 = arith.divf %18, %19 : vector<1x768xf32>
    %21 = vector.extract_strided_slice %20 {offsets = [0, 0], sizes = [1, 256], strides = [1, 1]} : vector<1x768xf32> to vector<1x256xf32>
    %22 = vector.extract_strided_slice %20 {offsets = [0, 256], sizes = [1, 256], strides = [1, 1]} : vector<1x768xf32> to vector<1x256xf32>
    %23 = vector.extract_strided_slice %20 {offsets = [0, 512], sizes = [1, 256], strides = [1, 1]} : vector<1x768xf32> to vector<1x256xf32>
    %24 = vector.extract_strided_slice %14 {offsets = [0, 768], sizes = [1, 256], strides = [1, 1]} : vector<1x1024xf32> to vector<1x256xf32>
    %25 = math.tanh %24 : vector<1x256xf32>
    %26 = arith.mulf %22, %2 : vector<1x256xf32>
    %27 = arith.mulf %21, %25 : vector<1x256xf32>
    %28 = arith.addf %26, %27 : vector<1x256xf32>
    %29 = math.tanh %28 : vector<1x256xf32>
    %30 = arith.mulf %23, %29 : vector<1x256xf32>
    %31 = arith.index_cast %c0_i32 : i32 to index
    %c0_9 = arith.constant 0 : index
    %32 = vector.load %arg7[%31, %c0_9] : memref<8x256xf32, #tpu.memory_space<vmem>>, vector<1x256xf32>
    tpu.vector_store %arg7[%31, %c0_9], %30 {strides = array<i32>} : memref<8x256xf32, #tpu.memory_space<vmem>>, vector<1x256xf32>,
    %c1_i32 = arith.constant 1 : i32
    %c0_10 = arith.constant 0 : index
    %c0_11 = arith.constant 0 : index
    %33 = vector.load %arg8[%c0_10, %c0_11] : memref<1x256xf32, #tpu.memory_space<vmem>>, vector<1x256xf32>
    tpu.vector_store %arg8[%c0_10, %c0_11], %30 {strides = array<i32>} : memref<1x256xf32, #tpu.memory_space<vmem>>, vector<1x256xf32>,
    %c0_12 = arith.constant 0 : index
    %c0_13 = arith.constant 0 : index
    %34 = vector.load %arg9[%c0_12, %c0_13] : memref<1x256xf32, #tpu.memory_space<vmem>>, vector<1x256xf32>
    tpu.vector_store %arg9[%c0_12, %c0_13], %28 {strides = array<i32>} : memref<1x256xf32, #tpu.memory_space<vmem>>, vector<1x256xf32>,
    return
  }
  func.func @transform_0(%arg0: i32, %arg1: memref<1x2xi32, #tpu.memory_space<smem>>) -> (i32, i32) {
    %c0_i32 = arith.constant 0 : i32
    %c0_i32_0 = arith.constant 0 : i32
    %c0_i32_1 = arith.constant 0 : i32
    return %c0_i32, %c0_i32_0 : i32, i32
  }
  func.func @transform_1(%arg0: i32, %arg1: memref<1x2xi32, #tpu.memory_space<smem>>) -> (i32, i32) {
    %c0_i32 = arith.constant 0 : i32
    %c0_i32_0 = arith.constant 0 : i32
    %c0_i32_1 = arith.constant 0 : i32
    return %c0_i32, %c0_i32_0 : i32, i32
  }
  func.func @transform_2(%arg0: i32, %arg1: memref<1x2xi32, #tpu.memory_space<smem>>) -> (i32, i32) {
    %c0_i32 = arith.constant 0 : i32
    %c0_i32_0 = arith.constant 0 : i32
    %c0_i32_1 = arith.constant 0 : i32
    return %c0_i32, %c0_i32_0 : i32, i32
  }
  func.func @transform_3(%arg0: i32, %arg1: memref<1x2xi32, #tpu.memory_space<smem>>) -> (i32, i32) {
    %c0_i32 = arith.constant 0 : i32
    %c0_i32_0 = arith.constant 0 : i32
    %c0_i32_1 = arith.constant 0 : i32
    return %c0_i32, %c0_i32_0 : i32, i32
  }
  func.func @transform_4(%arg0: i32, %arg1: memref<1x2xi32, #tpu.memory_space<smem>>) -> (i32, i32) {
    %c0_i32 = arith.constant 0 : i32
    %c0_i32_0 = arith.constant 0 : i32
    %c0_i32_1 = arith.constant 0 : i32
    return %c0_i32, %c0_i32_0 : i32, i32
  }
  func.func @transform_5(%arg0: i32, %arg1: memref<1x2xi32, #tpu.memory_space<smem>>) -> (i32, i32) {
    %c0_i32 = arith.constant 0 : i32
    %c0_i32_0 = arith.constant 0 : i32
    %c0_i32_1 = arith.constant 0 : i32
    return %c0_i32, %c0_i32_0 : i32, i32
  }
  func.func @transform_6(%arg0: i32, %arg1: memref<1x2xi32, #tpu.memory_space<smem>>) -> (i32, i32) {
    %c0_i32 = arith.constant 0 : i32
    %c0_i32_0 = arith.constant 0 : i32
    %c0_i32_1 = arith.constant 0 : i32
    return %c0_i32, %c0_i32_0 : i32, i32
  }
  func.func @transform_7(%arg0: i32, %arg1: memref<1x2xi32, #tpu.memory_space<smem>>) -> (i32, i32) {
    %c0_i32 = arith.constant 0 : i32
    %c0_i32_0 = arith.constant 0 : i32
    %c0_i32_1 = arith.constant 0 : i32
    return %c0_i32, %c0_i32_0 : i32, i32
  }
}

</mosaic_0001>

<bundles_post_ra>
// kernel: tpu_custom_call.1
= control target key start
LH: loop header
LB: loop body
LE: loop exit
PB: predicated region body
PF: predicated region fallthrough
CT: control target
= control target key end

     0   :  { %s1473_s27 = smov [#allocation3]   ;;  %s1590_s0 = inlined_call_operand.hbm [shape: s32[1,2], index: 0, kind: input, shape index: {}]   ;;  %s1591_s1 = inlined_call_operand.hbm [shape: f32[63,1024], index: 1, kind: input, shape index: {}]   ;;  %s1592_s2 = inlined_call_operand.hbm [shape: f32[20,1024], index: 2, kind: input, shape index: {}]   ;;  %s1593_s3 = inlined_call_operand.hbm [shape: bf16[256,1024], index: 3, kind: input, shape index: {}]   ;;  %s1594_s4 = inlined_call_operand.vmem [shape: f32[1,256], index: 4, kind: input, shape index: {}]   ;;  %s1595_s5 = inlined_call_operand.vmem [shape: f32[1,256], index: 5, kind: input, shape index: {}]   ;;  %s1596_s6 = inlined_call_operand.hbm [shape: f32[8,256], index: 6, kind: output, shape index: {0}]   ;;  %s1597_s7 = inlined_call_operand.hbm [shape: f32[1,256], index: 7, kind: output, shape index: {1}]   ;;  %s1598_s8 = inlined_call_operand.hbm [shape: f32[1,256], index: 8, kind: output, shape index: {2}]  }
   0x1   :  { %15 = dma.hbm_to_smem %s1590_s0, 16, %s1473_s27, [#allocation2] }
   0x2   :  { %1463 = dma.done.wait [#allocation2], 16 }
   0x3   :  { %1464 = vsyncadd [#allocation2], 4294967280 }
   0x4   :  { %17 = sfence }
   0x5   :  { %18 = vsyncpa [#allocation5], 0 }
   0x6   :  { %19 = vsyncpa [#allocation8], 0 }
   0x7   :  { %20 = vsyncpa [#allocation6], 0 }
   0x8   :  { %21 = vsyncpa [#allocation12], 0  ;;  %s1474_s30 = smov [#allocation7]   ;;  %s1475_s10 = smov [#allocation4]  }
   0x9   :  { %s39_s9 = sshll.u32 %s1474_s30, 4  ;;  %s27_s11 = sshll.u32 %s1475_s10, 4  ;;  %s40_s9 = int_to_ptr.vmem [resolvable:$true] %s39_s9  ;;  %s28_s11 = int_to_ptr.vmem [resolvable:$true] %s27_s11 }
   0xa   :  { %s1351_s12 = scalar_lea.vmem %s40_s9, 3072  ;;  %p1356_p1 = scmp.lt.s32.totalorder %s40_s9, %s40_s9 }
   0xb   :  { %p1352_p0 = scmp.ne.s32.totalorder %s40_s9, %s1351_s12  ;;  %p1357_p2 = scmp.lt.s32.totalorder %s1351_s12, %s1351_s12 }
   0xd   :  { %p1358_p3 = por %p1357_p2, %p1356_p1 }
   0xf   :  { %p1359_p4 = pnand %p1358_p3, %p1352_p0 }
  0x11   :  { %1362 = shalt.err (!%p1359_p4)
}
  0x12   :  { %s1476_s0 = smov 1024   ;;  %s1477_s13 = smov 64  }
  0x13   :  { %45 = dma.hbm_to_vmem [thread:$0]  %s1592_s2, 3072, %s40_s9, [#allocation8], %s1476_s0, %s1476_s0, %s1477_s13  }
  0x14   :  { %s1371_s16 = scalar_lea.vmem %s28_s11, 8192  ;;  %p1376_p6 = scmp.lt.s32.totalorder %s28_s11, %s28_s11 }
  0x15   :  { %p1372_p5 = scmp.ne.s32.totalorder %s28_s11, %s1371_s16  ;;  %p1377_p7 = scmp.lt.s32.totalorder %s1371_s16, %s1371_s16 }
  0x17   :  { %p1378_p8 = por %p1377_p7, %p1376_p6 }
  0x19   :  { %p1379_p9 = pnand %p1378_p8, %p1372_p5 }
  0x1b   :  { %1382 = shalt.err (!%p1379_p9)
}
  0x1c   :  { %33 = dma.hbm_to_vmem [thread:$0]  %s1591_s1, 8192, %s28_s11, [#allocation5], %s1476_s0, %s1476_s0, %s1477_s13  }
  0x1d   :  { %s1478_s19 = smov [#allocation9]  }
  0x1e   :  { %s51_s20 = sshll.u32 %s1478_s19, 4  ;;  %s52_s20 = int_to_ptr.vmem [resolvable:$true] %s51_s20 }
  0x1f   :  { %s1391_s21 = scalar_lea.vmem %s52_s20, 16384  ;;  %p1396_p11 = scmp.lt.s32.totalorder %s52_s20, %s52_s20 }
  0x20   :  { %p1392_p10 = scmp.ne.s32.totalorder %s52_s20, %s1391_s21  ;;  %p1397_p12 = scmp.lt.s32.totalorder %s1391_s21, %s1391_s21 }
  0x22   :  { %p1398_p13 = por %p1397_p12, %p1396_p11 }
  0x24   :  { %p1399_p0 = pnand %p1398_p13, %p1392_p10 }
  0x26   :  { %1402 = shalt.err (!%p1399_p0)
}
  0x27   :  { %s1479_s2 = smov 512   ;;  %s1480_s22 = smov 32  }
  0x28   :  { %57 = dma.hbm_to_vmem [thread:$0]  %s1593_s3, 16384, %s52_s20, [#allocation8], %s1479_s2, %s1479_s2, %s1480_s22  }
  0x29   :  { %1465 = dma.done.wait [#allocation5], 8192  }
  0x2a   :  { %1466 = vsyncadd [#allocation5], 4294959104 }
  0x2b   :  { %1467 = dma.done.wait [#allocation8], 19456  }
  0x2c   :  { %1468 = vsyncadd [#allocation8], 4294947840  ;;  %v127_v0 = vld [vmem:[#allocation9 + $0x1c0] sm:$0xff]  ;;  %v128_v2 = vld [vmem:[#allocation9 + $0x1c8] sm:$0xff]  ;;  %v227_v32 = vlaneseq  ;;  %s1179_s25 = sld [smem:[#allocation3 + $0x1]]  ;;  %s1482_s15 = smov [#allocation11]  }
  0x2d   :  { %v131_v1 = vld [vmem:[#allocation9 + $0x1e0] sm:$0xff]  ;;  %v132_v4 = vld [vmem:[#allocation9 + $0x1e8] sm:$0xff]  ;;  %s1146_s16 = sshll.u32 %s1482_s15, 4  ;;  %s1483_s17 = smov [#allocation10]   ;;  %s1147_s16 = int_to_ptr.vmem [resolvable:$true] %s1146_s16 }
  0x2e   :  { %v1241_v3 = vcombine.high %v127_v0, %v131_v1  ;;  %v1240_v5 = vcombine.low %v127_v0, %v131_v1  ;;  %v119_v6 = vld [vmem:[#allocation9 + $0x180] sm:$0xff]  ;;  %v1243_v8 = vcombine.high %v128_v2, %v132_v4  ;;  %v1242_v9 = vcombine.low %v128_v2, %v132_v4  ;;  %v120_v11 = vld [vmem:[#allocation9 + $0x188] sm:$0xff]  ;;  %s1136_s18 = sshll.u32 %s1483_s17, 4  ;;  %s1403_s20 = scalar_lea.vmem %s1147_s16, 32  ;;  %s1137_s18 = int_to_ptr.vmem [resolvable:$true] %s1136_s18 }
  0x2f   :  { %v123_v7 = vld [vmem:[#allocation9 + $0x1a0] sm:$0xff]  ;;  %v124_v12 = vld [vmem:[#allocation9 + $0x1a8] sm:$0xff]  ;;  %v1543_v41 = vshrl.u32 %v227_v32, 7  ;;  %vm1571_vm0 = vcmp.lt.s32.totalorder %v227_v32, 256  ;;  %p1404_p1 = scmp.ne.s32.totalorder %s1147_s16, %s1403_s20  ;;  %p1408_p2 = scmp.lt.s32.totalorder %s1147_s16, %s1147_s16 }
  0x30   :  { %v1233_v10 = vcombine.high %v119_v6, %v123_v7  ;;  %v111_v13 = vld [vmem:[#allocation9 + $0x140] sm:$0xff]  ;;  %879 = vmatprep.subr.bf16.mxu0 %v1241_v3  ;;  %v1235_v14 = vcombine.high %v120_v11, %v124_v12  ;;  %v112_v16 = vld [vmem:[#allocation9 + $0x148] sm:$0xff]  ;;  %920 = vmatprep.subr.bf16.mxu1 %v1243_v8  ;;  %v1232_v18 = vcombine.low %v119_v6, %v123_v7  ;;  %p1409_p3 = scmp.lt.s32.totalorder %s1403_s20, %s1403_s20 }
  0x31   :  { %v115_v15 = vld [vmem:[#allocation9 + $0x160] sm:$0xff]  ;;  %v116_v17 = vld [vmem:[#allocation9 + $0x168] sm:$0xff]  ;;  %880 = vmatpush1.bf16.msra.mxu0 %v1240_v5  ;;  %921 = vmatpush1.bf16.msra.mxu1 %v1242_v9  ;;  %v1234_v19 = vcombine.low %v120_v11, %v124_v12  ;;  %v233_v50 = vsub.s32 1, %v1543_v41 }
  0x32   :  { %881 = vmatprep.subr.bf16.mxu0 %v1233_v10  ;;  %v1225_v20 = vcombine.high %v111_v13, %v115_v15  ;;  %922 = vmatprep.subr.bf16.mxu1 %v1235_v14  ;;  %v1227_v21 = vcombine.high %v112_v16, %v116_v17  ;;  %v103_v22 = vld [vmem:[#allocation9 + $0x100] sm:$0xff]  ;;  %v104_v24 = vld [vmem:[#allocation9 + $0x108] sm:$0xff]  ;;  %v1224_v26 = vcombine.low %v111_v13, %v115_v15  ;;  %s214_s27 = sshra.s32 %s1179_s25, 3  ;;  %s217_s30 = sand.u32 7, %s1179_s25 }
  0x33   :  { %v107_v23 = vld [vmem:[#allocation9 + $0x120] sm:$0xff]  ;;  %v108_v25 = vld [vmem:[#allocation9 + $0x128] sm:$0xff]  ;;  %v1226_v27 = vcombine.low %v112_v16, %v116_v17  ;;  %s1314_s9 = sshll.u32 %s214_s27, 6  ;;  %p1410_p4 = por %p1409_p3, %p1408_p2 }
  0x34   :  { %v1217_v28 = vcombine.high %v103_v22, %v107_v23  ;;  %v1219_v29 = vcombine.high %v104_v24, %v108_v25  ;;  %v95_v30 = vld [vmem:[#allocation9 + $0xc0] sm:$0xff]  ;;  %v96_v33 = vld [vmem:[#allocation9 + $0xc8] sm:$0xff]  ;;  %v1216_v35 = vcombine.low %v103_v22, %v107_v23  ;;  %v1218_v36 = vcombine.low %v104_v24, %v108_v25  ;;  %s220_s11 = sadd.s32 %s1314_s9, %s217_s30 }
  0x35   :  { %882 = vmatpush1.bf16.msra.mxu0 %v1232_v18  ;;  %923 = vmatpush1.bf16.msra.mxu1 %v1234_v19  ;;  %v99_v31 = vld [vmem:[#allocation9 + $0xe0] sm:$0xff]  ;;  %v100_v34 = vld [vmem:[#allocation9 + $0xe8] sm:$0xff]  ;;  %s221_s0 = scalar_lea.vmem [#allocation7], %s220_s11  ;;  %p1411_p5 = pnand %p1410_p4, %p1404_p1 }
  0x36   :  { %883 = vmatprep.subr.bf16.mxu0 %v1225_v20  ;;  %924 = vmatprep.subr.bf16.mxu1 %v1227_v21  ;;  %v1209_v37 = vcombine.high %v95_v30, %v99_v31  ;;  %v1211_v38 = vcombine.high %v96_v33, %v100_v34  ;;  %v87_v39 = vld [vmem:[#allocation9 + $0x80] sm:$0xff]  ;;  %v88_v42 = vld [vmem:[#allocation9 + $0x88] sm:$0xff]  ;;  %v1208_v44 = vcombine.low %v95_v30, %v99_v31 }
  0x37   :  { %v91_v40 = vld [vmem:[#allocation9 + $0xa0] sm:$0xff]  ;;  %v92_v43 = vld [vmem:[#allocation9 + $0xa8] sm:$0xff]  ;;  %v1210_v45 = vcombine.low %v96_v33, %v100_v34 }
  0x38   :  { %v1201_v46 = vcombine.high %v87_v39, %v91_v40  ;;  %v1203_v47 = vcombine.high %v88_v42, %v92_v43  ;;  %v79_v48 = vld [vmem:[#allocation9 + $0x40] sm:$0xff]  ;;  %v80_v51 = vld [vmem:[#allocation9 + $0x48] sm:$0xff]  ;;  %v1200_v53 = vcombine.low %v87_v39, %v91_v40  ;;  %v1202_v54 = vcombine.low %v88_v42, %v92_v43 }
  0x39   :  { %884 = vmatpush1.bf16.msra.mxu0 %v1224_v26  ;;  %925 = vmatpush1.bf16.msra.mxu1 %v1226_v27  ;;  %v83_v49 = vld [vmem:[#allocation9 + $0x60] sm:$0xff]  ;;  %v84_v52 = vld [vmem:[#allocation9 + $0x68] sm:$0xff] }
  0x3a   :  { %885 = vmatprep.subr.bf16.mxu0 %v1217_v28  ;;  %926 = vmatprep.subr.bf16.mxu1 %v1219_v29  ;;  %v1193_v55 = vcombine.high %v79_v48, %v83_v49  ;;  %v1549_v56 = vld [vmem:[%s1594_s4] sm:$0x3]  ;;  %v1195_v57 = vcombine.high %v80_v51, %v84_v52  ;;  %v72_v61 = vld [vmem:[#allocation9 + $0x8] sm:$0xff]  ;;  %v1192_v63 = vcombine.low %v79_v48, %v83_v49  ;;  %s201_s4 = sld [smem:[#allocation3]] }
  0x3b   :  { %v71_v58 = vld [vmem:[#allocation9] sm:$0xff]  ;;  %v234_v60 = vrot.slane %v1549_v56, %v233_v50  ;;  %v76_v62 = vld [vmem:[#allocation9 + $0x28] sm:$0xff]  ;;  %v1194_v1 = vcombine.low %v80_v51, %v84_v52 }
  0x3c   :  { %v75_v59 = vld [vmem:[#allocation9 + $0x20] sm:$0xff]  ;;  %v1187_v3 = vcombine.high %v72_v61, %v76_v62  ;;  %v192_v6 = vld [vmem:[#allocation9 + $0x3c8] sm:$0xff]  ;;  %v1186_v9 = vcombine.low %v72_v61, %v76_v62 }
  0x3d   :  { %886 = vmatpush1.bf16.msra.mxu0 %v1216_v35  ;;  %927 = vmatpush1.bf16.msra.mxu1 %v1218_v36  ;;  %v1552_v0 = vpack.c.bf16 %v234_v60, %v234_v60  ;;  %v1185_v2 = vcombine.high %v71_v58, %v75_v59  ;;  %v191_v4 = vld [vmem:[#allocation9 + $0x3c0] sm:$0xff]  ;;  %v196_v7 = vld [vmem:[#allocation9 + $0x3e8] sm:$0xff]  ;;  %v1184_v8 = vcombine.low %v71_v58, %v75_v59 }
  0x3e   :  { %887 = vmatprep.subr.bf16.mxu0 %v1209_v37  ;;  %928 = vmatprep.subr.bf16.mxu1 %v1211_v38  ;;  %v195_v5 = vld [vmem:[#allocation9 + $0x3e0] sm:$0xff]  ;;  %v1307_v11 = vcombine.high %v192_v6, %v196_v7  ;;  %v184_v14 = vld [vmem:[#allocation9 + $0x388] sm:$0xff]  ;;  %v1306_v17 = vcombine.low %v192_v6, %v196_v7 }
  0x3f   :  { %911 = vmatprep.mubr.bf16.mxu0 %v1552_v0  ;;  %952 = vmatprep.mubr.bf16.mxu1 %v1552_v0  ;;  %v1305_v10 = vcombine.high %v191_v4, %v195_v5  ;;  %v183_v12 = vld [vmem:[#allocation9 + $0x380] sm:$0xff]  ;;  %v188_v15 = vld [vmem:[#allocation9 + $0x3a8] sm:$0xff]  ;;  %v1304_v16 = vcombine.low %v191_v4, %v195_v5  ;;  %v229_v4 = vsub.s32 0, %v1543_v41 }
  0x40   :  { %v187_v13 = vld [vmem:[#allocation9 + $0x3a0] sm:$0xff]  ;;  %v1299_v19 = vcombine.high %v184_v14, %v188_v15  ;;  %v176_v22 = vld [vmem:[#allocation9 + $0x348] sm:$0xff]  ;;  %v1298_v25 = vcombine.low %v184_v14, %v188_v15  ;;  %s203_s26 = sshra.s32 %s201_s4, 3  ;;  %s206_s28 = sand.u32 7, %s201_s4 }
  0x41   :  { %888 = vmatpush1.bf16.msra.mxu0 %v1208_v44  ;;  %929 = vmatpush1.bf16.msra.mxu1 %v1210_v45  ;;  %v1297_v18 = vcombine.high %v183_v12, %v187_v13  ;;  %v175_v20 = vld [vmem:[#allocation9 + $0x340] sm:$0xff]  ;;  %v180_v23 = vld [vmem:[#allocation9 + $0x368] sm:$0xff]  ;;  %v1296_v24 = vcombine.low %v183_v12, %v187_v13  ;;  %v130_v12 = vld [vmem:[#allocation9 + $0x1d8] sm:$0xff]  ;;  %s1313_s29 = sshll.u32 %s203_s26, 6 }
  0x42   :  { %889 = vmatprep.subr.bf16.mxu0 %v1201_v46  ;;  %930 = vmatprep.subr.bf16.mxu1 %v1203_v47  ;;  %v179_v21 = vld [vmem:[#allocation9 + $0x360] sm:$0xff]  ;;  %v1291_v27 = vcombine.high %v176_v22, %v180_v23  ;;  %v168_v30 = vld [vmem:[#allocation9 + $0x308] sm:$0xff]  ;;  %v1290_v34 = vcombine.low %v176_v22, %v180_v23  ;;  %v134_v13 = vld [vmem:[#allocation9 + $0x1f8] sm:$0xff]  ;;  %s209_s10 = sadd.s32 %s1313_s29, %s206_s28 }
  0x43   :  { %v1289_v26 = vcombine.high %v175_v20, %v179_v21  ;;  %v167_v28 = vld [vmem:[#allocation9 + $0x300] sm:$0xff]  ;;  %v172_v31 = vld [vmem:[#allocation9 + $0x328] sm:$0xff]  ;;  %v1288_v33 = vcombine.low %v175_v20, %v179_v21  ;;  %v122_v21 = vld [vmem:[#allocation9 + $0x198] sm:$0xff]  ;;  %s210_s12 = scalar_lea.vmem [#allocation4], %s209_s10 }
  0x44   :  { %v171_v29 = vld [vmem:[#allocation9 + $0x320] sm:$0xff]  ;;  %v1283_v36 = vcombine.high %v168_v30, %v172_v31  ;;  %v160_v39 = vld [vmem:[#allocation9 + $0x2c8] sm:$0xff]  ;;  %v1282_v43 = vcombine.low %v168_v30, %v172_v31  ;;  %v126_v22 = vld [vmem:[#allocation9 + $0x1b8] sm:$0xff] }
  0x45   :  { %890 = vmatpush1.bf16.msra.mxu0 %v1200_v53  ;;  %931 = vmatpush1.bf16.msra.mxu1 %v1202_v54  ;;  %v1281_v35 = vcombine.high %v167_v28, %v171_v29  ;;  %v159_v37 = vld [vmem:[#allocation9 + $0x2c0] sm:$0xff]  ;;  %v164_v40 = vld [vmem:[#allocation9 + $0x2e8] sm:$0xff]  ;;  %v1280_v42 = vcombine.low %v167_v28, %v171_v29  ;;  %v114_v28 = vld [vmem:[#allocation9 + $0x158] sm:$0xff]  ;;  %v1238_v31 = vcombine.low %v122_v21, %v126_v22 }
  0x46   :  { %891 = vmatprep.subr.bf16.mxu0 %v1193_v55  ;;  %932 = vmatprep.subr.bf16.mxu1 %v1195_v57  ;;  %v163_v38 = vld [vmem:[#allocation9 + $0x2e0] sm:$0xff]  ;;  %v1275_v45 = vcombine.high %v160_v39, %v164_v40  ;;  %v152_v48 = vld [vmem:[#allocation9 + $0x288] sm:$0xff]  ;;  %v1274_v51 = vcombine.low %v160_v39, %v164_v40  ;;  %v118_v29 = vld [vmem:[#allocation9 + $0x178] sm:$0xff] }
  0x47   :  { %v1273_v44 = vcombine.high %v159_v37, %v163_v38  ;;  %v151_v46 = vld [vmem:[#allocation9 + $0x280] sm:$0xff]  ;;  %v156_v49 = vld [vmem:[#allocation9 + $0x2a8] sm:$0xff]  ;;  %v1272_v50 = vcombine.low %v159_v37, %v163_v38  ;;  %v106_v37 = vld [vmem:[#allocation9 + $0x118] sm:$0xff]  ;;  %v1230_v40 = vcombine.low %v114_v28, %v118_v29 }
  0x48   :  { %v155_v47 = vld [vmem:[#allocation9 + $0x2a0] sm:$0xff]  ;;  %v1267_v53 = vcombine.high %v152_v48, %v156_v49  ;;  %v144_v57 = vld [vmem:[#allocation9 + $0x248] sm:$0xff]  ;;  %v1266_v60 = vcombine.low %v152_v48, %v156_v49  ;;  %v110_v38 = vld [vmem:[#allocation9 + $0x138] sm:$0xff] }
  0x49   :  { %892 = vmatpush1.bf16.msra.mxu0 %v1192_v63  ;;  %933 = vmatpush1.bf16.msra.mxu1 %v1194_v1  ;;  %v1265_v52 = vcombine.high %v151_v46, %v155_v47  ;;  %v143_v54 = vld [vmem:[#allocation9 + $0x240] sm:$0xff]  ;;  %v148_v58 = vld [vmem:[#allocation9 + $0x268] sm:$0xff]  ;;  %v1264_v59 = vcombine.low %v151_v46, %v155_v47  ;;  %v98_v46 = vld [vmem:[#allocation9 + $0xd8] sm:$0xff]  ;;  %v1222_v49 = vcombine.low %v106_v37, %v110_v38 }
  0x4a   :  { %893 = vmatprep.subr.bf16.mxu0 %v1185_v2  ;;  %934 = vmatprep.subr.bf16.mxu1 %v1187_v3  ;;  %v147_v55 = vld [vmem:[#allocation9 + $0x260] sm:$0xff]  ;;  %v1259_v62 = vcombine.high %v144_v57, %v148_v58  ;;  %v136_v2 = vld [vmem:[#allocation9 + $0x208] sm:$0xff]  ;;  %v1258_v6 = vcombine.low %v144_v57, %v148_v58  ;;  %v102_v47 = vld [vmem:[#allocation9 + $0xf8] sm:$0xff] }
  0x4b   :  { %v1257_v61 = vcombine.high %v143_v54, %v147_v55  ;;  %v135_v63 = vld [vmem:[#allocation9 + $0x200] sm:$0xff]  ;;  %v140_v3 = vld [vmem:[#allocation9 + $0x228] sm:$0xff]  ;;  %v1256_v5 = vcombine.low %v143_v54, %v147_v55  ;;  %v94_v54 = vld [vmem:[#allocation9 + $0xb8] sm:$0xff]  ;;  %v1214_v57 = vcombine.low %v98_v46, %v102_v47 }
  0x4c   :  { %v139_v1 = vld [vmem:[#allocation9 + $0x220] sm:$0xff]  ;;  %v1250_v15 = vcombine.low %v136_v2, %v140_v3 }
  0x4d   :  { %894 = vmatpush1.bf16.msra.mxu0 %v1184_v8  ;;  %935 = vmatpush1.bf16.msra.mxu1 %v1186_v9  ;;  %v1249_v7 = vcombine.high %v135_v63, %v139_v1  ;;  %v1251_v8 = vcombine.high %v136_v2, %v140_v3  ;;  %v129_v9 = vld [vmem:[#allocation9 + $0x1d0] sm:$0xff]  ;;  %v1248_v14 = vcombine.low %v135_v63, %v139_v1  ;;  %v86_v63 = vld [vmem:[#allocation9 + $0x78] sm:$0xff] }
  0x4e   :  { %895 = vmatprep.subr.bf16.mxu0 %v1305_v10  ;;  %936 = vmatprep.subr.bf16.mxu1 %v1307_v11  ;;  %v133_v10 = vld [vmem:[#allocation9 + $0x1f0] sm:$0xff]  ;;  %v230_v11 = vrot.slane %v1549_v56, %v229_v4  ;;  %v1246_v56 = vcombine.low %v130_v12, %v134_v13 }
  0x4f   :  { %v1244_v23 = vcombine.low %v129_v9, %v133_v10 }
  0x50   :  { %v1558_v20 = vpack.c.bf16 %v230_v11, %v230_v11 }
  0x51   :  { %896 = vmatpush2.bf16.msra.mxu0 %v1304_v16  ;;  %937 = vmatpush2.bf16.msra.mxu1 %v1306_v17  ;;  %v1245_v16 = vcombine.high %v129_v9, %v133_v10  ;;  %v1247_v17 = vcombine.high %v130_v12, %v134_v13  ;;  %v193_v13 = vld [vmem:[#allocation9 + $0x3d0] sm:$0xff] }
  0x52   :  { %897 = vmatprep.subr.bf16.mxu0 %v1297_v18  ;;  %938 = vmatprep.subr.bf16.mxu1 %v1299_v19  ;;  %v121_v18 = vld [vmem:[#allocation9 + $0x190] sm:$0xff] }
  0x53   :  { %v125_v19 = vld [vmem:[#allocation9 + $0x1b0] sm:$0xff] }
  0x54   :  { %v1236_v30 = vcombine.low %v121_v18, %v125_v19 }
  0x55   :  { %898 = vmatpush2.bf16.msra.mxu0 %v1296_v24  ;;  %939 = vmatpush2.bf16.msra.mxu1 %v1298_v25  ;;  %v1237_v24 = vcombine.high %v121_v18, %v125_v19  ;;  %v1239_v25 = vcombine.high %v122_v21, %v126_v22  ;;  %v185_v22 = vld [vmem:[#allocation9 + $0x390] sm:$0xff] }
  0x56   :  { %899 = vmatprep.subr.bf16.mxu0 %v1289_v26  ;;  %940 = vmatprep.subr.bf16.mxu1 %v1291_v27  ;;  %v113_v26 = vld [vmem:[#allocation9 + $0x150] sm:$0xff] }
  0x57   :  { %v117_v27 = vld [vmem:[#allocation9 + $0x170] sm:$0xff] }
  0x58   :  { %v1228_v39 = vcombine.low %v113_v26, %v117_v27 }
  0x59   :  { %900 = vmatpush2.bf16.msra.mxu0 %v1288_v33  ;;  %941 = vmatpush2.bf16.msra.mxu1 %v1290_v34  ;;  %v1229_v33 = vcombine.high %v113_v26, %v117_v27  ;;  %v1231_v34 = vcombine.high %v114_v28, %v118_v29  ;;  %v177_v29 = vld [vmem:[#allocation9 + $0x350] sm:$0xff] }
  0x5a   :  { %901 = vmatprep.subr.bf16.mxu0 %v1281_v35  ;;  %942 = vmatprep.subr.bf16.mxu1 %v1283_v36  ;;  %v105_v35 = vld [vmem:[#allocation9 + $0x110] sm:$0xff] }
  0x5b   :  { %v109_v36 = vld [vmem:[#allocation9 + $0x130] sm:$0xff] }
  0x5c   :  { %v1220_v48 = vcombine.low %v105_v35, %v109_v36 }
  0x5d   :  { %902 = vmatpush2.bf16.msra.mxu0 %v1280_v42  ;;  %943 = vmatpush2.bf16.msra.mxu1 %v1282_v43  ;;  %v1221_v42 = vcombine.high %v105_v35, %v109_v36  ;;  %v1223_v43 = vcombine.high %v106_v37, %v110_v38  ;;  %v169_v38 = vld [vmem:[#allocation9 + $0x310] sm:$0xff] }
  0x5e   :  { %903 = vmatprep.subr.bf16.mxu0 %v1273_v44  ;;  %944 = vmatprep.subr.bf16.mxu1 %v1275_v45  ;;  %v97_v44 = vld [vmem:[#allocation9 + $0xd0] sm:$0xff] }
  0x5f   :  { %v101_v45 = vld [vmem:[#allocation9 + $0xf0] sm:$0xff] }
  0x60   :  { %v1212_v55 = vcombine.low %v97_v44, %v101_v45 }
  0x61   :  { %904 = vmatpush2.bf16.msra.mxu0 %v1272_v50  ;;  %945 = vmatpush2.bf16.msra.mxu1 %v1274_v51  ;;  %v1213_v50 = vcombine.high %v97_v44, %v101_v45  ;;  %v89_v51 = vld [vmem:[#allocation9 + $0x90] sm:$0xff] }
  0x62   :  { %905 = vmatprep.subr.bf16.mxu0 %v1265_v52  ;;  %946 = vmatprep.subr.bf16.mxu1 %v1267_v53  ;;  %v93_v52 = vld [vmem:[#allocation9 + $0xb0] sm:$0xff]  ;;  %v90_v53 = vld [vmem:[#allocation9 + $0x98] sm:$0xff] }
  0x63   :  { %v1205_v58 = vcombine.high %v89_v51, %v93_v52  ;;  %v1204_v1 = vcombine.low %v89_v51, %v93_v52  ;;  %v1206_v2 = vcombine.low %v90_v53, %v94_v54 }
  0x65   :  { %906 = vmatpush2.bf16.msra.mxu0 %v1264_v59  ;;  %947 = vmatpush2.bf16.msra.mxu1 %v1266_v60  ;;  %v1207_v59 = vcombine.high %v90_v53, %v94_v54  ;;  %v81_v60 = vld [vmem:[#allocation9 + $0x50] sm:$0xff] }
  0x66   :  { %907 = vmatprep.subr.bf16.mxu0 %v1257_v61  ;;  %948 = vmatprep.subr.bf16.mxu1 %v1259_v62  ;;  %v85_v61 = vld [vmem:[#allocation9 + $0x70] sm:$0xff]  ;;  %v82_v62 = vld [vmem:[#allocation9 + $0x58] sm:$0xff] }
  0x67   :  { %v1197_v3 = vcombine.high %v81_v60, %v85_v61  ;;  %v1199_v4 = vcombine.high %v82_v62, %v86_v63  ;;  %v1196_v9 = vcombine.low %v81_v60, %v85_v61  ;;  %v1198_v10 = vcombine.low %v82_v62, %v86_v63  ;;  %v153_v54 = vld [vmem:[#allocation9 + $0x290] sm:$0xff] }
  0x68   :  { %v145_v63 = vld [vmem:[#allocation9 + $0x250] sm:$0xff] }
  0x69   :  { %908 = vmatpush2.bf16.msra.mxu0 %v1256_v5  ;;  %949 = vmatpush2.bf16.msra.mxu1 %v1258_v6  ;;  %v73_v5 = vld [vmem:[#allocation9 + $0x10] sm:$0xff] }
  0x6a   :  { %909 = vmatprep.subr.bf16.mxu0 %v1249_v7  ;;  %950 = vmatprep.subr.bf16.mxu1 %v1251_v8  ;;  %v77_v6 = vld [vmem:[#allocation9 + $0x30] sm:$0xff]  ;;  %v74_v7 = vld [vmem:[#allocation9 + $0x18] sm:$0xff] }
  0x6b   :  { %v78_v8 = vld [vmem:[#allocation9 + $0x38] sm:$0xff]  ;;  %v1189_v11 = vcombine.high %v73_v5, %v77_v6 }
  0x6c   :  { %v1191_v12 = vcombine.high %v74_v7, %v78_v8  ;;  %v1190_v18 = vcombine.low %v74_v7, %v78_v8  ;;  %v137_v8 = vld [vmem:[#allocation9 + $0x210] sm:$0xff] }
  0x6d   :  { %910 = vmatpush2.bf16.msra.mxu0 %v1248_v14  ;;  %951 = vmatpush2.bf16.msra.mxu1 %v1250_v15  ;;  %v197_v14 = vld [vmem:[#allocation9 + $0x3f0] sm:$0xff]  ;;  %v194_v15 = vld [vmem:[#allocation9 + $0x3d8] sm:$0xff] }
  0x6e   :  { %961 = vmatprep.subr.bf16.mxu0 %v1245_v16  ;;  %1002 = vmatprep.subr.bf16.mxu1 %v1247_v17  ;;  %v198_v16 = vld [vmem:[#allocation9 + $0x3f8] sm:$0xff]  ;;  %v1188_v17 = vcombine.low %v73_v5, %v77_v6  ;;  %v1309_v19 = vcombine.high %v193_v13, %v197_v14 }
  0x6f   :  { %v1311_v21 = vcombine.high %v194_v15, %v198_v16  ;;  %v1310_v26 = vcombine.low %v194_v15, %v198_v16 }
  0x70   :  { %912 = vmatmul.mubr.bf16.vlgmr.msra.gmra.mxu0 %v1558_v20  ;;  %953 = vmatmul.mubr.bf16.vlgmr.msra.gmra.mxu1 %v1558_v20 }
  0x71   :  { %962 = vmatpush1.bf16.msra.mxu0 %v1244_v23  ;;  %1003 = vmatpush1.bf16.msra.mxu1 %v1246_v56  ;;  %v189_v23 = vld [vmem:[#allocation9 + $0x3b0] sm:$0xff]  ;;  %v186_v56 = vld [vmem:[#allocation9 + $0x398] sm:$0xff] }
  0x72   :  { %963 = vmatprep.subr.bf16.mxu0 %v1237_v24  ;;  %1004 = vmatprep.subr.bf16.mxu1 %v1239_v25  ;;  %v190_v24 = vld [vmem:[#allocation9 + $0x3b8] sm:$0xff]  ;;  %v1308_v25 = vcombine.low %v193_v13, %v197_v14  ;;  %v1301_v27 = vcombine.high %v185_v22, %v189_v23 }
  0x73   :  { %993 = vmatprep.mubr.bf16.mxu0 %v1552_v0  ;;  %1034 = vmatprep.mubr.bf16.mxu1 %v1552_v0  ;;  %v1215_v0 = vcombine.high %v98_v46, %v102_v47  ;;  %v1303_v28 = vcombine.high %v186_v56, %v190_v24  ;;  %v1302_v35 = vcombine.low %v186_v56, %v190_v24  ;;  %v161_v47 = vld [vmem:[#allocation9 + $0x2d0] sm:$0xff] }
  0x75   :  { %964 = vmatpush1.bf16.msra.mxu0 %v1236_v30  ;;  %1005 = vmatpush1.bf16.msra.mxu1 %v1238_v31  ;;  %v181_v30 = vld [vmem:[#allocation9 + $0x370] sm:$0xff]  ;;  %v178_v31 = vld [vmem:[#allocation9 + $0x358] sm:$0xff] }
  0x76   :  { %965 = vmatprep.subr.bf16.mxu0 %v1229_v33  ;;  %1006 = vmatprep.subr.bf16.mxu1 %v1231_v34  ;;  %v182_v33 = vld [vmem:[#allocation9 + $0x378] sm:$0xff]  ;;  %v1300_v34 = vcombine.low %v185_v22, %v189_v23  ;;  %v1293_v36 = vcombine.high %v177_v29, %v181_v30 }
  0x77   :  { %v1295_v37 = vcombine.high %v178_v31, %v182_v33  ;;  %v1294_v44 = vcombine.low %v178_v31, %v182_v33 }
  0x79   :  { %966 = vmatpush1.bf16.msra.mxu0 %v1228_v39  ;;  %1007 = vmatpush1.bf16.msra.mxu1 %v1230_v40  ;;  %v173_v39 = vld [vmem:[#allocation9 + $0x330] sm:$0xff]  ;;  %v170_v40 = vld [vmem:[#allocation9 + $0x318] sm:$0xff] }
  0x7a   :  { %967 = vmatprep.subr.bf16.mxu0 %v1221_v42  ;;  %1008 = vmatprep.subr.bf16.mxu1 %v1223_v43  ;;  %v174_v42 = vld [vmem:[#allocation9 + $0x338] sm:$0xff]  ;;  %v1292_v43 = vcombine.low %v177_v29, %v181_v30  ;;  %v1285_v45 = vcombine.high %v169_v38, %v173_v39 }
  0x7b   :  { %v1287_v46 = vcombine.high %v170_v40, %v174_v42  ;;  %v1286_v51 = vcombine.low %v170_v40, %v174_v42  ;;  %v222_v42 = vld [vmem:[%s221_s0] ss:$8 sm:$0xf] }
  0x7d   :  { %968 = vmatpush1.bf16.msra.mxu0 %v1220_v48  ;;  %1009 = vmatpush1.bf16.msra.mxu1 %v1222_v49  ;;  %v165_v48 = vld [vmem:[#allocation9 + $0x2f0] sm:$0xff]  ;;  %v162_v49 = vld [vmem:[#allocation9 + $0x2d8] sm:$0xff] }
  0x7e   :  { %969 = vmatprep.subr.bf16.mxu0 %v1213_v50  ;;  %1010 = vmatprep.subr.bf16.mxu1 %v1215_v0  ;;  %v166_v50 = vld [vmem:[#allocation9 + $0x2f8] sm:$0xff]  ;;  %v1284_v0 = vcombine.low %v169_v38, %v173_v39  ;;  %v1277_v52 = vcombine.high %v161_v47, %v165_v48 }
  0x7f   :  { %v1279_v53 = vcombine.high %v162_v49, %v166_v50  ;;  %v1278_v60 = vcombine.low %v162_v49, %v166_v50  ;;  %v211_v38 = vld [vmem:[%s210_s12] ss:$8 sm:$0xf] }
  0x80   :  { %v212_v39 = vld [vmem:[%s210_s12] ss:$8 sm:$0xf0] }
  0x81   :  { %970 = vmatpush1.bf16.msra.mxu0 %v1212_v55  ;;  %1011 = vmatpush1.bf16.msra.mxu1 %v1214_v57  ;;  %v157_v55 = vld [vmem:[#allocation9 + $0x2b0] sm:$0xff]  ;;  %v154_v57 = vld [vmem:[#allocation9 + $0x298] sm:$0xff]  ;;  %v213_v49 = vor.u32 %v212_v39, %v211_v38 }
  0x82   :  { %971 = vmatprep.subr.bf16.mxu0 %v1205_v58  ;;  %1012 = vmatprep.subr.bf16.mxu1 %v1207_v59  ;;  %v158_v58 = vld [vmem:[#allocation9 + $0x2b8] sm:$0xff]  ;;  %v1276_v59 = vcombine.low %v161_v47, %v165_v48  ;;  %v1269_v61 = vcombine.high %v153_v54, %v157_v55 }
  0x83   :  { %v1271_v62 = vcombine.high %v154_v57, %v158_v58  ;;  %v1270_v5 = vcombine.low %v154_v57, %v158_v58 }
  0x85   :  { %972 = vmatpush1.bf16.msra.mxu0 %v1204_v1  ;;  %1013 = vmatpush1.bf16.msra.mxu1 %v1206_v2  ;;  %v149_v1 = vld [vmem:[#allocation9 + $0x270] sm:$0xff]  ;;  %v146_v2 = vld [vmem:[#allocation9 + $0x258] sm:$0xff] }
  0x86   :  { %973 = vmatprep.subr.bf16.mxu0 %v1197_v3  ;;  %1014 = vmatprep.subr.bf16.mxu1 %v1199_v4  ;;  %v150_v3 = vld [vmem:[#allocation9 + $0x278] sm:$0xff]  ;;  %v1268_v4 = vcombine.low %v153_v54, %v157_v55  ;;  %v1261_v6 = vcombine.high %v145_v63, %v149_v1 }
  0x87   :  { %v1263_v7 = vcombine.high %v146_v2, %v150_v3  ;;  %v1262_v13 = vcombine.low %v146_v2, %v150_v3 }
  0x89   :  { %974 = vmatpush1.bf16.msra.mxu0 %v1196_v9  ;;  %1015 = vmatpush1.bf16.msra.mxu1 %v1198_v10  ;;  %v141_v9 = vld [vmem:[#allocation9 + $0x230] sm:$0xff]  ;;  %v138_v10 = vld [vmem:[#allocation9 + $0x218] sm:$0xff] }
  0x8a   :  { %975 = vmatprep.subr.bf16.mxu0 %v1189_v11  ;;  %1016 = vmatprep.subr.bf16.mxu1 %v1191_v12  ;;  %v142_v11 = vld [vmem:[#allocation9 + $0x238] sm:$0xff]  ;;  %v1260_v12 = vcombine.low %v145_v63, %v149_v1  ;;  %v1253_v14 = vcombine.high %v137_v8, %v141_v9  ;;  %v1252_v16 = vcombine.low %v137_v8, %v141_v9  ;;  %v200_v1 = vld [vmem:[%s1595_s5] sm:$0x3]  ;;  %s1484_s5 = smov [#allocation13]  }
  0x8b   :  { %v1255_v15 = vcombine.high %v138_v10, %v142_v11  ;;  %s1156_s19 = sshll.u32 %s1484_s5, 4  ;;  %s1157_s19 = int_to_ptr.vmem [resolvable:$true] %s1156_s19 }
  0x8d   :  { %976 = vmatpush1.bf16.msra.mxu0 %v1188_v17  ;;  %1017 = vmatpush1.bf16.msra.mxu1 %v1190_v18  ;;  %v1254_v17 = vcombine.low %v138_v10, %v142_v11  ;;  %v1481_v18 = vmov 1966171168  }
  0x8e   :  { %977 = vmatprep.subr.bf16.mxu0 %v1309_v19  ;;  %1018 = vmatprep.subr.bf16.mxu1 %v1311_v21  ;;  %v1056_v19 = vunpack.c.l.s4 %v1481_v18 }
  0x90   :  { %v1057_v21 = vunpack.c.0.s8 %v1056_v19 }
  0x91   :  { %978 = vmatpush2.bf16.msra.mxu0 %v1308_v25  ;;  %1019 = vmatpush2.bf16.msra.mxu1 %v1310_v26 }
  0x92   :  { %979 = vmatprep.subr.bf16.mxu0 %v1301_v27  ;;  %1020 = vmatprep.subr.bf16.mxu1 %v1303_v28  ;;  %v1060_v23 = vsub.s32 %v1057_v21, %v1543_v41 }
  0x95   :  { %980 = vmatpush2.bf16.msra.mxu0 %v1300_v34  ;;  %1021 = vmatpush2.bf16.msra.mxu1 %v1302_v35 }
  0x96   :  { %981 = vmatprep.subr.bf16.mxu0 %v1293_v36  ;;  %1022 = vmatprep.subr.bf16.mxu1 %v1295_v37 }
  0x99   :  { %982 = vmatpush2.bf16.msra.mxu0 %v1292_v43  ;;  %1023 = vmatpush2.bf16.msra.mxu1 %v1294_v44  ;;  %v223_v43 = vld [vmem:[%s221_s0] ss:$8 sm:$0xf0] }
  0x9a   :  { %983 = vmatprep.subr.bf16.mxu0 %v1285_v45  ;;  %1024 = vmatprep.subr.bf16.mxu1 %v1287_v46  ;;  %v224_v50 = vor.u32 %v223_v43, %v222_v42 }
  0x9c   :  { %v225_v54 = vadd.f32 %v224_v50, %v213_v49 }
  0x9d   :  { %984 = vmatpush2.bf16.msra.mxu0 %v1284_v0  ;;  %1025 = vmatpush2.bf16.msra.mxu1 %v1286_v51 }
  0x9e   :  { %985 = vmatprep.subr.bf16.mxu0 %v1277_v52  ;;  %1026 = vmatprep.subr.bf16.mxu1 %v1279_v53 }
  0xa1   :  { %986 = vmatpush2.bf16.msra.mxu0 %v1276_v59  ;;  %1027 = vmatpush2.bf16.msra.mxu1 %v1278_v60 }
  0xa2   :  { %987 = vmatprep.subr.bf16.mxu0 %v1269_v61  ;;  %1028 = vmatprep.subr.bf16.mxu1 %v1271_v62 }
  0xa5   :  { %988 = vmatpush2.bf16.msra.mxu0 %v1268_v4  ;;  %1029 = vmatpush2.bf16.msra.mxu1 %v1270_v5 }
  0xa6   :  { %989 = vmatprep.subr.bf16.mxu0 %v1261_v6  ;;  %1030 = vmatprep.subr.bf16.mxu1 %v1263_v7 }
  0xa9   :  { %990 = vmatpush2.bf16.msra.mxu0 %v1260_v12  ;;  %1031 = vmatpush2.bf16.msra.mxu1 %v1262_v13 }
  0xaa   :  { %991 = vmatprep.subr.bf16.mxu0 %v1253_v14  ;;  %1032 = vmatprep.subr.bf16.mxu1 %v1255_v15 }
  0xad   :  { %992 = vmatpush2.bf16.msra.mxu0 %v1252_v16  ;;  %1033 = vmatpush2.bf16.msra.mxu1 %v1254_v17 }
  0xb0   :  { %994 = vmatmul.mubr.bf16.vlgmr.msra.gmra.mxu0 %v1558_v20  ;;  %1035 = vmatmul.mubr.bf16.vlgmr.msra.gmra.mxu1 %v1558_v20 }
 0x130   :  { %v913_v22 = vpop.f32.mrf.mxu0  ;;  %v954_v56 = vpop.f32.mrf.mxu1 }
 0x132   :  { %v915_v24 = vpop.f32.mrf.mxu0  ;;  %v956_v26 = vpop.f32.mrf.mxu1 }
 0x133   :  { %v1051_v25 = vcombine.low %v913_v22, %v915_v24  ;;  %v1052_v27 = vcombine.low %v954_v56, %v956_v26 }
 0x134   :  { %v917_v28 = vpop.f32.mrf.mxu0  ;;  %v958_v30 = vpop.f32.mrf.mxu1 }
 0x135   :  { %v1061_v29 = vrot.slane %v1051_v25, %v1060_v23  ;;  %v1068_v31 = vrot.slane %v1052_v27, %v1060_v23 }
 0x136   :  { %v918_v33 = vpop.f32.mrf.mxu0  ;;  %v959_v34 = vpop.f32.mrf.mxu1 }
 0x137   :  { %v1083_v35 = vcombine.low %v1061_v29, %v1068_v31 }
 0x139   :  { %v1091_v36 = vrot.slane %v1083_v35, %v1060_v23 }
 0x170   :  { %v995_v41 = vpop.f32.mrf.mxu0  ;;  %v1036_v20 = vpop.f32.mrf.mxu1 }
 0x172   :  { %v997_v37 = vpop.f32.mrf.mxu0  ;;  %v1038_v44 = vpop.f32.mrf.mxu1 }
 0x173   :  { %v1053_v40 = vcombine.low %v995_v41, %v997_v37  ;;  %v1054_v45 = vcombine.low %v1036_v20, %v1038_v44 }
 0x174   :  { %v999_v46 = vpop.f32.mrf.mxu0  ;;  %v1040_v48 = vpop.f32.mrf.mxu1 }
 0x175   :  { %v1075_v47 = vrot.slane %v1053_v40, %v1060_v23  ;;  %v1082_v0 = vrot.slane %v1054_v45, %v1060_v23 }
 0x176   :  { %v1000_v51 = vpop.f32.mrf.mxu0  ;;  %v1041_v52 = vpop.f32.mrf.mxu1 }
 0x177   :  { %v1084_v53 = vcombine.low %v1075_v47, %v1082_v0 }
 0x179   :  { %v1098_v55 = vrot.slane %v1084_v53, %v1060_v23 }
 0x17b   :  { %v1099_v57 = vcombine.low %v1091_v36, %v1098_v55 }
 0x17d   :  { %v1101_v58 = vadd.f32 %v1099_v57, %v225_v54 }
 0x17f   :  { %v1312_v59 = vmul.f32 -1.442695, %v1101_v58  ;;  %v1109_v62 = vrot.slane %v1101_v58, 6 }
 0x181   :  { %1327 = vpow2.f32 %v1312_v59 }
 0x18e   :  { %v1328_v60 = vpop.eup %1327 }
 0x18f   :  { %v1105_v61 = vadd.f32 1.0, %v1328_v60 }
 0x191   :  { %1329 = vrcp.f32 %v1105_v61 }
 0x192   :  { %1331 = vtanh.f32 %v1109_v62 }
 0x19e   :  { %v1330_v63 = vpop.eup %1329 }
 0x19f   :  { %v1113_v2 = vrot.slane %v1330_v63, 2  ;;  %v1332_v3 = vpop.eup %1331  ;;  %v1119_v8 = vrot.slane %v1330_v63, 4 }
 0x1a0   :  { %v1116_v5 = vmul.f32 %v1332_v3, %v1330_v63 }
 0x1a1   :  { %v1115_v4 = vmul.f32 %v1113_v2, %v200_v1 }
 0x1a3   :  { %v1117_v7 = vadd.f32 %v1116_v5, %v1115_v4 }
 0x1a5   :  { %1333 = vtanh.f32 %v1117_v7  ;;  %1129 = vst.msk [vmem:[#allocation13] sm:$0x3] %vm1571_vm0, %v1117_v7 }
 0x1b2   :  { %v1334_v9 = vpop.eup %1333 }
 0x1b3   :  { %v1121_v10 = vmul.f32 %v1334_v9, %v1119_v8 }
 0x1b5   :  { %1128 = vst.msk [vmem:[#allocation11] sm:$0x3] %vm1571_vm0, %v1121_v10  ;;  %1126 = vst.msk [vmem:[#allocation10] ss:$8 sm:$0x3] %vm1571_vm0, %v1121_v10 }
 0x1b6   :  { %1414 = shalt.err (!%p1411_p5)
}
 0x1b7   :  { %1149 = dma.vmem_to_hbm [thread:$0]  %s1147_s16, 32, %s1597_s7, [#allocation12]  }
 0x1b8   :  { %s1423_s22 = scalar_lea.vmem %s1137_s18, 256  ;;  %p1428_p7 = scmp.lt.s32.totalorder %s1137_s18, %s1137_s18 }
 0x1b9   :  { %p1424_p6 = scmp.ne.s32.totalorder %s1137_s18, %s1423_s22  ;;  %p1429_p8 = scmp.lt.s32.totalorder %s1423_s22, %s1423_s22 }
 0x1bb   :  { %p1430_p9 = por %p1429_p8, %p1428_p7 }
 0x1bd   :  { %p1431_p10 = pnand %p1430_p9, %p1424_p6 }
 0x1bf   :  { %1434 = shalt.err (!%p1431_p10)
}
 0x1c0   :  { %1139 = dma.vmem_to_hbm [thread:$0]  %s1137_s18, 256, %s1596_s6, [#allocation6]  }
 0x1c1   :  { %s1443_s1 = scalar_lea.vmem %s1157_s19, 32  ;;  %p1448_p12 = scmp.lt.s32.totalorder %s1157_s19, %s1157_s19 }
 0x1c2   :  { %p1444_p11 = scmp.ne.s32.totalorder %s1157_s19, %s1443_s1  ;;  %p1449_p13 = scmp.lt.s32.totalorder %s1443_s1, %s1443_s1 }
 0x1c4   :  { %p1450_p0 = por %p1449_p13, %p1448_p12 }
 0x1c6   :  { %p1451_p1 = pnand %p1450_p0, %p1444_p11 }
 0x1c8   :  { %1454 = shalt.err (!%p1451_p1)
}
 0x1c9   :  { %1159 = dma.vmem_to_hbm [thread:$0]  %s1157_s19, 32, %s1598_s8, [#allocation12]  }
 0x1ca   :  { %1469 = dma.done.wait [#allocation6], 256  }
 0x1cb   :  { %1470 = vsyncadd [#allocation6], 4294967040 }
 0x1cc   :  { %1471 = dma.done.wait [#allocation12], 64  }
 0x1cd   :  { %1472 = vsyncadd [#allocation12], 4294967232 }
 0x1ce   :  { %1169 = vsyncpa [#allocation5], 1 }
 0x1cf   :  { %1170 = vsyncpa [#allocation8], 1 }
 0x1d0   :  { %1171 = vsyncpa [#allocation6], 1 }
 0x1d1   :  { %1172 = vsyncpa [#allocation12], 1 }

</bundles_post_ra>
